<compile_context>
chip_gen: v7x
topology: tpu7x:2x2x1
jax: 0.10.0
libtpu: 0.0.40
codegen_flags: <defaults>
</compile_context>

<pallas_src>
import functools

import jax
import jax.numpy as jnp
from jax.experimental import pallas as pl
from jax.experimental.pallas import tpu as pltpu

C_IN, C_OUT, K, STRIDE, PAD = 3, 16, 3, 2, 1
TAPS = C_IN * K * K                # 27
PAD_EDGE = K - 1 - PAD             # direct-conv zero pad on the dilated input
LANE = 128


def _round_up(n, m):
    return (n + m - 1) // m * m


def _convt_kernel(w_ref, b_ref, xp_ref, o_ref, patch_ref, *, Wp, Lpad):
    """Single grid step = all 16 output channels.

    w_ref     : VMEM (C_OUT, 27)       f32  direct-conv weights (co, ci*K*K)
    b_ref     : VMEM (C_OUT, 1)        f32  bias column
    xp_ref    : VMEM (C_IN, pad_len)   f32  flattened dilated+padded (min'd) input
    o_ref     : VMEM (C_OUT, Lpad)     f32  lane-dense "wide" flattened output
    patch_ref : VMEM (27, Lpad)        f32  im2col scratch
    """
    # Build the im2col patch matrix: each tap is a contiguous, lane-shifted
    # slice of the flattened dilated input (static offsets).  min(x, 0.8) has
    # already been applied in the wrapper.
    t = 0
    for ci in range(C_IN):
        for kh in range(K):
            for kw in range(K):
                off = kh * Wp + kw                                   # static
                patch_ref[pl.ds(t, 1), :] = xp_ref[pl.ds(ci, 1), pl.ds(off, Lpad)]
                t += 1

    # Single MXU matmul: (C_OUT, 27) @ (27, Lpad) -> (C_OUT, Lpad).
    acc = jnp.dot(w_ref[...], patch_ref[...],
                  preferred_element_type=jnp.float32)
    acc = acc + b_ref[...]                                           # bias
    # v3..v6: clamp(conv + 3, 0, 6) / 6 — vectorized epilogue, lane-dense store.
    o_ref[...] = jnp.clip(acc + 3.0, 0.0, 6.0) * (1.0 / 6.0)


def prepare_params(w_pt, b_pt):
    """Precompute (once, outside jit) the direct-conv weight matrix and bias.

    w_pt: ConvTranspose2d weight (C_IN, C_OUT, K, K); b_pt: (C_OUT,).
    """
    # (ci, co, kh, kw) -> (co, ci, kh, kw), spatially flipped -> (C_OUT, 27).
    w_direct = jnp.transpose(w_pt, (1, 0, 2, 3))[:, :, ::-1, ::-1]
    w_mat = w_direct.reshape(C_OUT, TAPS).astype(jnp.float32)
    b_col = b_pt.reshape(C_OUT, 1).astype(jnp.float32)
    return w_mat, b_col


def model_forward(x, w_mat, b_col):
    """x: (1, C_IN, H, W).  Returns (1, C_OUT, 2H-1, 2W-1)."""
    N, cin, H, W = x.shape
    assert N == 1 and cin == C_IN
    Hp, Wp = STRIDE * H + 1, STRIDE * W + 1       # dilated + padded input dims
    Ho, Wo = STRIDE * H - 1, STRIDE * W - 1       # ConvTranspose output dims
    L = Ho * Wp                                   # true wide flattened length
    Lpad = _round_up(L, LANE)                     # lane-dense store width
    max_off = (K - 1) * Wp + (K - 1)
    pad_len = _round_up(max(Lpad + max_off, Hp * Wp), LANE)

    # v1 = min(x, 0.8) applied ONCE here; it fuses into the XLA dilation pad.
    v1 = jnp.minimum(x[0].astype(jnp.float32), 0.8)
    # Dilate (interior zeros, stride-1) + zero-pad the borders in one XLA pad.
    xp = jax.lax.pad(v1, 0.0,
                     ((0, 0, 0),
                      (PAD_EDGE, PAD_EDGE, STRIDE - 1),
                      (PAD_EDGE, PAD_EDGE, STRIDE - 1)))             # (C_IN, Hp, Wp)
    xp_flat = jnp.pad(xp.reshape(C_IN, Hp * Wp),
                      ((0, 0), (0, pad_len - Hp * Wp)))              # (C_IN, pad_len)

    kernel = functools.partial(_convt_kernel, Wp=Wp, Lpad=Lpad)

    out_wide = pl.pallas_call(
        kernel,
        out_shape=jax.ShapeDtypeStruct((C_OUT, Lpad), jnp.float32),
        grid=(1,),
        in_specs=[
            pl.BlockSpec((C_OUT, TAPS), lambda i: (0, 0)),           # weights
            pl.BlockSpec((C_OUT, 1), lambda i: (0, 0)),              # bias
            pl.BlockSpec((C_IN, pad_len), lambda i: (0, 0)),         # input
        ],
        out_specs=pl.BlockSpec((C_OUT, Lpad), lambda i: (0, 0)),
        scratch_shapes=[pltpu.VMEM((TAPS, Lpad), jnp.float32)],
        compiler_params=pltpu.CompilerParams(
            dimension_semantics=("arbitrary",)),
    )(w_mat, b_col, xp_flat)

    # Drop the padded lanes and the K-1 wrap-around ("wide") columns per row.
    out = out_wide[:, :L].reshape(C_OUT, Ho, Wp)[:, :, :Wo]
    return out[None]                              # (1, C_OUT, Ho, Wo)


def _reference(x, w_pt, b_pt):
    """Pure-JAX reference (dilated correlation) for the same math."""
    v1 = jnp.minimum(x.astype(jnp.float32), 0.8)
    w_direct = jnp.transpose(w_pt, (1, 0, 2, 3))[:, :, ::-1, ::-1].astype(jnp.float32)
    conv = jax.lax.conv_general_dilated(
        v1, w_direct, window_strides=(1, 1),
        padding=[(PAD_EDGE, PAD_EDGE), (PAD_EDGE, PAD_EDGE)],
        lhs_dilation=(STRIDE, STRIDE),
        dimension_numbers=("NCHW", "OIHW", "NCHW"),
        precision=jax.lax.Precision.HIGHEST)
    conv = conv + b_pt.astype(jnp.float32)[None, :, None, None]
    return jnp.clip(conv + 3.0, 0.0, 6.0) / 6.0


if __name__ == "__main__":
    key = jax.random.PRNGKey(0)
    kx, kw, kb = jax.random.split(key, 3)

    # Small shapes consistent with the module (N=1, C_in=3 fixed by the conv).
    H = W = 16
    x = jax.random.normal(kx, (1, C_IN, H, W), dtype=jnp.float32)
    w_pt = 0.1 * jax.random.normal(kw, (C_IN, C_OUT, K, K), dtype=jnp.float32)
    b_pt = 0.05 * jax.random.normal(kb, (C_OUT,), dtype=jnp.float32)

    # Weight transform hoisted out of the per-call jit path (static params).
    w_mat, b_col = prepare_params(w_pt, b_pt)

    fwd = jax.jit(model_forward)
    out = jax.block_until_ready(fwd(x, w_mat, b_col))

    ref = jax.block_until_ready(_reference(x, w_pt, b_pt))
    assert out.shape == (1, C_OUT, 2 * H - 1, 2 * W - 1), out.shape
    assert jnp.allclose(out, ref, atol=1e-4, rtol=1e-4), float(
        jnp.max(jnp.abs(out - ref)))

    print("KERNEL_OK")
</pallas_src>

<mosaic_0001>
module attributes {stable_mosaic.version = 11 : i64} {
  func.func @_convt_kernel(%arg0: i32, %arg1: memref<16x27xf32, #tpu.memory_space<vmem>>, %arg2: memref<16x1xf32, #tpu.memory_space<vmem>>, %arg3: memref<3x1152xf32, #tpu.memory_space<vmem>>, %arg4: memref<16x1024xf32, #tpu.memory_space<vmem>>, %arg5: memref<27x1024xf32, #tpu.memory_space<vmem>>) attributes {dimension_semantics = [#tpu.dimension_semantics<arbitrary>], iteration_bounds = array<i64: 1>, scalar_prefetch = 0 : i64, scratch_operands = 1 : i64, tpu.core_type = #tpu.core_type<tc>, window_params = [{pipeline_mode = #tpu.pipeline_mode<synchronous>, transform_indices = @transform_0, window_bounds = array<i64: 16, 27>}, {pipeline_mode = #tpu.pipeline_mode<synchronous>, transform_indices = @transform_1, window_bounds = array<i64: 16, 1>}, {pipeline_mode = #tpu.pipeline_mode<synchronous>, transform_indices = @transform_2, window_bounds = array<i64: 3, 1152>}, {pipeline_mode = #tpu.pipeline_mode<synchronous>, transform_indices = @transform_3, window_bounds = array<i64: 16, 1024>}]} {
    %c0 = arith.constant 0 : index
    %c0_0 = arith.constant 0 : index
    %0 = vector.load %arg3[%c0, %c0_0] : memref<3x1152xf32, #tpu.memory_space<vmem>>, vector<1x1024xf32>
    %c0_1 = arith.constant 0 : index
    %c0_2 = arith.constant 0 : index
    %1 = vector.load %arg5[%c0_1, %c0_2] : memref<27x1024xf32, #tpu.memory_space<vmem>>, vector<1x1024xf32>
    tpu.vector_store %arg5[%c0_1, %c0_2], %0 {strides = array<i32>} : memref<27x1024xf32, #tpu.memory_space<vmem>>, vector<1x1024xf32>,
    %c0_3 = arith.constant 0 : index
    %c1 = arith.constant 1 : index
    %2 = vector.load %arg3[%c0_3, %c1] : memref<3x1152xf32, #tpu.memory_space<vmem>>, vector<1x1024xf32>
    %c1_4 = arith.constant 1 : index
    %c0_5 = arith.constant 0 : index
    %3 = vector.load %arg5[%c1_4, %c0_5] : memref<27x1024xf32, #tpu.memory_space<vmem>>, vector<1x1024xf32>
    tpu.vector_store %arg5[%c1_4, %c0_5], %2 {strides = array<i32>} : memref<27x1024xf32, #tpu.memory_space<vmem>>, vector<1x1024xf32>,
    %c0_6 = arith.constant 0 : index
    %c2 = arith.constant 2 : index
    %4 = vector.load %arg3[%c0_6, %c2] : memref<3x1152xf32, #tpu.memory_space<vmem>>, vector<1x1024xf32>
    %c2_7 = arith.constant 2 : index
    %c0_8 = arith.constant 0 : index
    %5 = vector.load %arg5[%c2_7, %c0_8] : memref<27x1024xf32, #tpu.memory_space<vmem>>, vector<1x1024xf32>
    tpu.vector_store %arg5[%c2_7, %c0_8], %4 {strides = array<i32>} : memref<27x1024xf32, #tpu.memory_space<vmem>>, vector<1x1024xf32>,
    %c0_9 = arith.constant 0 : index
    %c33 = arith.constant 33 : index
    %6 = vector.load %arg3[%c0_9, %c33] : memref<3x1152xf32, #tpu.memory_space<vmem>>, vector<1x1024xf32>
    %c3 = arith.constant 3 : index
    %c0_10 = arith.constant 0 : index
    %7 = vector.load %arg5[%c3, %c0_10] : memref<27x1024xf32, #tpu.memory_space<vmem>>, vector<1x1024xf32>
    tpu.vector_store %arg5[%c3, %c0_10], %6 {strides = array<i32>} : memref<27x1024xf32, #tpu.memory_space<vmem>>, vector<1x1024xf32>,
    %c0_11 = arith.constant 0 : index
    %c34 = arith.constant 34 : index
    %8 = vector.load %arg3[%c0_11, %c34] : memref<3x1152xf32, #tpu.memory_space<vmem>>, vector<1x1024xf32>
    %c4 = arith.constant 4 : index
    %c0_12 = arith.constant 0 : index
    %9 = vector.load %arg5[%c4, %c0_12] : memref<27x1024xf32, #tpu.memory_space<vmem>>, vector<1x1024xf32>
    tpu.vector_store %arg5[%c4, %c0_12], %8 {strides = array<i32>} : memref<27x1024xf32, #tpu.memory_space<vmem>>, vector<1x1024xf32>,
    %c0_13 = arith.constant 0 : index
    %c35 = arith.constant 35 : index
    %10 = vector.load %arg3[%c0_13, %c35] : memref<3x1152xf32, #tpu.memory_space<vmem>>, vector<1x1024xf32>
    %c5 = arith.constant 5 : index
    %c0_14 = arith.constant 0 : index
    %11 = vector.load %arg5[%c5, %c0_14] : memref<27x1024xf32, #tpu.memory_space<vmem>>, vector<1x1024xf32>
    tpu.vector_store %arg5[%c5, %c0_14], %10 {strides = array<i32>} : memref<27x1024xf32, #tpu.memory_space<vmem>>, vector<1x1024xf32>,
    %c0_15 = arith.constant 0 : index
    %c66 = arith.constant 66 : index
    %12 = vector.load %arg3[%c0_15, %c66] : memref<3x1152xf32, #tpu.memory_space<vmem>>, vector<1x1024xf32>
    %c6 = arith.constant 6 : index
    %c0_16 = arith.constant 0 : index
    %13 = vector.load %arg5[%c6, %c0_16] : memref<27x1024xf32, #tpu.memory_space<vmem>>, vector<1x1024xf32>
    tpu.vector_store %arg5[%c6, %c0_16], %12 {strides = array<i32>} : memref<27x1024xf32, #tpu.memory_space<vmem>>, vector<1x1024xf32>,
    %c0_17 = arith.constant 0 : index
    %c67 = arith.constant 67 : index
    %14 = vector.load %arg3[%c0_17, %c67] : memref<3x1152xf32, #tpu.memory_space<vmem>>, vector<1x1024xf32>
    %c7 = arith.constant 7 : index
    %c0_18 = arith.constant 0 : index
    %15 = vector.load %arg5[%c7, %c0_18] : memref<27x1024xf32, #tpu.memory_space<vmem>>, vector<1x1024xf32>
    tpu.vector_store %arg5[%c7, %c0_18], %14 {strides = array<i32>} : memref<27x1024xf32, #tpu.memory_space<vmem>>, vector<1x1024xf32>,
    %c0_19 = arith.constant 0 : index
    %c68 = arith.constant 68 : index
    %16 = vector.load %arg3[%c0_19, %c68] : memref<3x1152xf32, #tpu.memory_space<vmem>>, vector<1x1024xf32>
    %c8 = arith.constant 8 : index
    %c0_20 = arith.constant 0 : index
    %17 = vector.load %arg5[%c8, %c0_20] : memref<27x1024xf32, #tpu.memory_space<vmem>>, vector<1x1024xf32>
    tpu.vector_store %arg5[%c8, %c0_20], %16 {strides = array<i32>} : memref<27x1024xf32, #tpu.memory_space<vmem>>, vector<1x1024xf32>,
    %c1_21 = arith.constant 1 : index
    %c0_22 = arith.constant 0 : index
    %18 = vector.load %arg3[%c1_21, %c0_22] : memref<3x1152xf32, #tpu.memory_space<vmem>>, vector<1x1024xf32>
    %c9 = arith.constant 9 : index
    %c0_23 = arith.constant 0 : index
    %19 = vector.load %arg5[%c9, %c0_23] : memref<27x1024xf32, #tpu.memory_space<vmem>>, vector<1x1024xf32>
    tpu.vector_store %arg5[%c9, %c0_23], %18 {strides = array<i32>} : memref<27x1024xf32, #tpu.memory_space<vmem>>, vector<1x1024xf32>,
    %c1_24 = arith.constant 1 : index
    %c1_25 = arith.constant 1 : index
    %20 = vector.load %arg3[%c1_24, %c1_25] : memref<3x1152xf32, #tpu.memory_space<vmem>>, vector<1x1024xf32>
    %c10 = arith.constant 10 : index
    %c0_26 = arith.constant 0 : index
    %21 = vector.load %arg5[%c10, %c0_26] : memref<27x1024xf32, #tpu.memory_space<vmem>>, vector<1x1024xf32>
    tpu.vector_store %arg5[%c10, %c0_26], %20 {strides = array<i32>} : memref<27x1024xf32, #tpu.memory_space<vmem>>, vector<1x1024xf32>,
    %c1_27 = arith.constant 1 : index
    %c2_28 = arith.constant 2 : index
    %22 = vector.load %arg3[%c1_27, %c2_28] : memref<3x1152xf32, #tpu.memory_space<vmem>>, vector<1x1024xf32>
    %c11 = arith.constant 11 : index
    %c0_29 = arith.constant 0 : index
    %23 = vector.load %arg5[%c11, %c0_29] : memref<27x1024xf32, #tpu.memory_space<vmem>>, vector<1x1024xf32>
    tpu.vector_store %arg5[%c11, %c0_29], %22 {strides = array<i32>} : memref<27x1024xf32, #tpu.memory_space<vmem>>, vector<1x1024xf32>,
    %c1_30 = arith.constant 1 : index
    %c33_31 = arith.constant 33 : index
    %24 = vector.load %arg3[%c1_30, %c33_31] : memref<3x1152xf32, #tpu.memory_space<vmem>>, vector<1x1024xf32>
    %c12 = arith.constant 12 : index
    %c0_32 = arith.constant 0 : index
    %25 = vector.load %arg5[%c12, %c0_32] : memref<27x1024xf32, #tpu.memory_space<vmem>>, vector<1x1024xf32>
    tpu.vector_store %arg5[%c12, %c0_32], %24 {strides = array<i32>} : memref<27x1024xf32, #tpu.memory_space<vmem>>, vector<1x1024xf32>,
    %c1_33 = arith.constant 1 : index
    %c34_34 = arith.constant 34 : index
    %26 = vector.load %arg3[%c1_33, %c34_34] : memref<3x1152xf32, #tpu.memory_space<vmem>>, vector<1x1024xf32>
    %c13 = arith.constant 13 : index
    %c0_35 = arith.constant 0 : index
    %27 = vector.load %arg5[%c13, %c0_35] : memref<27x1024xf32, #tpu.memory_space<vmem>>, vector<1x1024xf32>
    tpu.vector_store %arg5[%c13, %c0_35], %26 {strides = array<i32>} : memref<27x1024xf32, #tpu.memory_space<vmem>>, vector<1x1024xf32>,
    %c1_36 = arith.constant 1 : index
    %c35_37 = arith.constant 35 : index
    %28 = vector.load %arg3[%c1_36, %c35_37] : memref<3x1152xf32, #tpu.memory_space<vmem>>, vector<1x1024xf32>
    %c14 = arith.constant 14 : index
    %c0_38 = arith.constant 0 : index
    %29 = vector.load %arg5[%c14, %c0_38] : memref<27x1024xf32, #tpu.memory_space<vmem>>, vector<1x1024xf32>
    tpu.vector_store %arg5[%c14, %c0_38], %28 {strides = array<i32>} : memref<27x1024xf32, #tpu.memory_space<vmem>>, vector<1x1024xf32>,
    %c1_39 = arith.constant 1 : index
    %c66_40 = arith.constant 66 : index
    %30 = vector.load %arg3[%c1_39, %c66_40] : memref<3x1152xf32, #tpu.memory_space<vmem>>, vector<1x1024xf32>
    %c15 = arith.constant 15 : index
    %c0_41 = arith.constant 0 : index
    %31 = vector.load %arg5[%c15, %c0_41] : memref<27x1024xf32, #tpu.memory_space<vmem>>, vector<1x1024xf32>
    tpu.vector_store %arg5[%c15, %c0_41], %30 {strides = array<i32>} : memref<27x1024xf32, #tpu.memory_space<vmem>>, vector<1x1024xf32>,
    %c1_42 = arith.constant 1 : index
    %c67_43 = arith.constant 67 : index
    %32 = vector.load %arg3[%c1_42, %c67_43] : memref<3x1152xf32, #tpu.memory_space<vmem>>, vector<1x1024xf32>
    %c16 = arith.constant 16 : index
    %c0_44 = arith.constant 0 : index
    %33 = vector.load %arg5[%c16, %c0_44] : memref<27x1024xf32, #tpu.memory_space<vmem>>, vector<1x1024xf32>
    tpu.vector_store %arg5[%c16, %c0_44], %32 {strides = array<i32>} : memref<27x1024xf32, #tpu.memory_space<vmem>>, vector<1x1024xf32>,
    %c1_45 = arith.constant 1 : index
    %c68_46 = arith.constant 68 : index
    %34 = vector.load %arg3[%c1_45, %c68_46] : memref<3x1152xf32, #tpu.memory_space<vmem>>, vector<1x1024xf32>
    %c17 = arith.constant 17 : index
    %c0_47 = arith.constant 0 : index
    %35 = vector.load %arg5[%c17, %c0_47] : memref<27x1024xf32, #tpu.memory_space<vmem>>, vector<1x1024xf32>
    tpu.vector_store %arg5[%c17, %c0_47], %34 {strides = array<i32>} : memref<27x1024xf32, #tpu.memory_space<vmem>>, vector<1x1024xf32>,
    %c2_48 = arith.constant 2 : index
    %c0_49 = arith.constant 0 : index
    %36 = vector.load %arg3[%c2_48, %c0_49] : memref<3x1152xf32, #tpu.memory_space<vmem>>, vector<1x1024xf32>
    %c18 = arith.constant 18 : index
    %c0_50 = arith.constant 0 : index
    %37 = vector.load %arg5[%c18, %c0_50] : memref<27x1024xf32, #tpu.memory_space<vmem>>, vector<1x1024xf32>
    tpu.vector_store %arg5[%c18, %c0_50], %36 {strides = array<i32>} : memref<27x1024xf32, #tpu.memory_space<vmem>>, vector<1x1024xf32>,
    %c2_51 = arith.constant 2 : index
    %c1_52 = arith.constant 1 : index
    %38 = vector.load %arg3[%c2_51, %c1_52] : memref<3x1152xf32, #tpu.memory_space<vmem>>, vector<1x1024xf32>
    %c19 = arith.constant 19 : index
    %c0_53 = arith.constant 0 : index
    %39 = vector.load %arg5[%c19, %c0_53] : memref<27x1024xf32, #tpu.memory_space<vmem>>, vector<1x1024xf32>
    tpu.vector_store %arg5[%c19, %c0_53], %38 {strides = array<i32>} : memref<27x1024xf32, #tpu.memory_space<vmem>>, vector<1x1024xf32>,
    %c2_54 = arith.constant 2 : index
    %c2_55 = arith.constant 2 : index
    %40 = vector.load %arg3[%c2_54, %c2_55] : memref<3x1152xf32, #tpu.memory_space<vmem>>, vector<1x1024xf32>
    %c20 = arith.constant 20 : index
    %c0_56 = arith.constant 0 : index
    %41 = vector.load %arg5[%c20, %c0_56] : memref<27x1024xf32, #tpu.memory_space<vmem>>, vector<1x1024xf32>
    tpu.vector_store %arg5[%c20, %c0_56], %40 {strides = array<i32>} : memref<27x1024xf32, #tpu.memory_space<vmem>>, vector<1x1024xf32>,
    %c2_57 = arith.constant 2 : index
    %c33_58 = arith.constant 33 : index
    %42 = vector.load %arg3[%c2_57, %c33_58] : memref<3x1152xf32, #tpu.memory_space<vmem>>, vector<1x1024xf32>
    %c21 = arith.constant 21 : index
    %c0_59 = arith.constant 0 : index
    %43 = vector.load %arg5[%c21, %c0_59] : memref<27x1024xf32, #tpu.memory_space<vmem>>, vector<1x1024xf32>
    tpu.vector_store %arg5[%c21, %c0_59], %42 {strides = array<i32>} : memref<27x1024xf32, #tpu.memory_space<vmem>>, vector<1x1024xf32>,
    %c2_60 = arith.constant 2 : index
    %c34_61 = arith.constant 34 : index
    %44 = vector.load %arg3[%c2_60, %c34_61] : memref<3x1152xf32, #tpu.memory_space<vmem>>, vector<1x1024xf32>
    %c22 = arith.constant 22 : index
    %c0_62 = arith.constant 0 : index
    %45 = vector.load %arg5[%c22, %c0_62] : memref<27x1024xf32, #tpu.memory_space<vmem>>, vector<1x1024xf32>
    tpu.vector_store %arg5[%c22, %c0_62], %44 {strides = array<i32>} : memref<27x1024xf32, #tpu.memory_space<vmem>>, vector<1x1024xf32>,
    %c2_63 = arith.constant 2 : index
    %c35_64 = arith.constant 35 : index
    %46 = vector.load %arg3[%c2_63, %c35_64] : memref<3x1152xf32, #tpu.memory_space<vmem>>, vector<1x1024xf32>
    %c23 = arith.constant 23 : index
    %c0_65 = arith.constant 0 : index
    %47 = vector.load %arg5[%c23, %c0_65] : memref<27x1024xf32, #tpu.memory_space<vmem>>, vector<1x1024xf32>
    tpu.vector_store %arg5[%c23, %c0_65], %46 {strides = array<i32>} : memref<27x1024xf32, #tpu.memory_space<vmem>>, vector<1x1024xf32>,
    %c2_66 = arith.constant 2 : index
    %c66_67 = arith.constant 66 : index
    %48 = vector.load %arg3[%c2_66, %c66_67] : memref<3x1152xf32, #tpu.memory_space<vmem>>, vector<1x1024xf32>
    %c24 = arith.constant 24 : index
    %c0_68 = arith.constant 0 : index
    %49 = vector.load %arg5[%c24, %c0_68] : memref<27x1024xf32, #tpu.memory_space<vmem>>, vector<1x1024xf32>
    tpu.vector_store %arg5[%c24, %c0_68], %48 {strides = array<i32>} : memref<27x1024xf32, #tpu.memory_space<vmem>>, vector<1x1024xf32>,
    %c2_69 = arith.constant 2 : index
    %c67_70 = arith.constant 67 : index
    %50 = vector.load %arg3[%c2_69, %c67_70] : memref<3x1152xf32, #tpu.memory_space<vmem>>, vector<1x1024xf32>
    %c25 = arith.constant 25 : index
    %c0_71 = arith.constant 0 : index
    %51 = vector.load %arg5[%c25, %c0_71] : memref<27x1024xf32, #tpu.memory_space<vmem>>, vector<1x1024xf32>
    tpu.vector_store %arg5[%c25, %c0_71], %50 {strides = array<i32>} : memref<27x1024xf32, #tpu.memory_space<vmem>>, vector<1x1024xf32>,
    %c2_72 = arith.constant 2 : index
    %c68_73 = arith.constant 68 : index
    %52 = vector.load %arg3[%c2_72, %c68_73] : memref<3x1152xf32, #tpu.memory_space<vmem>>, vector<1x1024xf32>
    %c26 = arith.constant 26 : index
    %c0_74 = arith.constant 0 : index
    %53 = vector.load %arg5[%c26, %c0_74] : memref<27x1024xf32, #tpu.memory_space<vmem>>, vector<1x1024xf32>
    tpu.vector_store %arg5[%c26, %c0_74], %52 {strides = array<i32>} : memref<27x1024xf32, #tpu.memory_space<vmem>>, vector<1x1024xf32>,
    %c0_75 = arith.constant 0 : index
    %c0_76 = arith.constant 0 : index
    %54 = vector.load %arg1[%c0_75, %c0_76] : memref<16x27xf32, #tpu.memory_space<vmem>>, vector<16x27xf32>
    %c0_77 = arith.constant 0 : index
    %c0_78 = arith.constant 0 : index
    %55 = vector.load %arg5[%c0_77, %c0_78] : memref<27x1024xf32, #tpu.memory_space<vmem>>, vector<27x1024xf32>
    %cst = arith.constant dense<0.000000e+00> : vector<16x1024xf32>
    %56 = tpu.matmul %54, %55, %cst {dimension_numbers = #tpu.dot_dimension_numbers<[1], [0], [0], [1], [0, 0, 1, 1], [], []>} : vector<16x27xf32>, vector<27x1024xf32>, vector<16x1024xf32> -> vector<16x1024xf32>
    %c0_79 = arith.constant 0 : index
    %c0_80 = arith.constant 0 : index
    %57 = vector.load %arg2[%c0_79, %c0_80] : memref<16x1xf32, #tpu.memory_space<vmem>>, vector<16x1xf32>
    %58 = vector.broadcast %57 : vector<16x1xf32> to vector<16x1024xf32>
    %59 = arith.addf %56, %58 : vector<16x1024xf32>
    %cst_81 = arith.constant 3.000000e+00 : f32
    %60 = vector.broadcast %cst_81 : f32 to vector<16x1024xf32>
    %61 = arith.addf %59, %60 : vector<16x1024xf32>
    %cst_82 = arith.constant 0.000000e+00 : f32
    %cst_83 = arith.constant 6.000000e+00 : f32
    %62 = vector.broadcast %cst_82 : f32 to vector<16x1024xf32>
    %63 = arith.maximumf %62, %61 : vector<16x1024xf32>
    %64 = vector.broadcast %cst_83 : f32 to vector<16x1024xf32>
    %65 = arith.minimumf %64, %63 : vector<16x1024xf32>
    %cst_84 = arith.constant 0.166666672 : f32
    %66 = vector.broadcast %cst_84 : f32 to vector<16x1024xf32>
    %67 = arith.mulf %65, %66 : vector<16x1024xf32>
    %c0_85 = arith.constant 0 : index
    %c0_86 = arith.constant 0 : index
    %68 = vector.load %arg4[%c0_85, %c0_86] : memref<16x1024xf32, #tpu.memory_space<vmem>>, vector<16x1024xf32>
    tpu.vector_store %arg4[%c0_85, %c0_86], %67 {strides = array<i32>} : memref<16x1024xf32, #tpu.memory_space<vmem>>, vector<16x1024xf32>,
    return
  }
  func.func @transform_0(%arg0: i32) -> (i32, i32) {
    %c0_i32 = arith.constant 0 : i32
    %c0_i32_0 = arith.constant 0 : i32
    %c0_i32_1 = arith.constant 0 : i32
    return %c0_i32, %c0_i32_0 : i32, i32
  }
  func.func @transform_1(%arg0: i32) -> (i32, i32) {
    %c0_i32 = arith.constant 0 : i32
    %c0_i32_0 = arith.constant 0 : i32
    %c0_i32_1 = arith.constant 0 : i32
    return %c0_i32, %c0_i32_0 : i32, i32
  }
  func.func @transform_2(%arg0: i32) -> (i32, i32) {
    %c0_i32 = arith.constant 0 : i32
    %c0_i32_0 = arith.constant 0 : i32
    %c0_i32_1 = arith.constant 0 : i32
    return %c0_i32, %c0_i32_0 : i32, i32
  }
  func.func @transform_3(%arg0: i32) -> (i32, i32) {
    %c0_i32 = arith.constant 0 : i32
    %c0_i32_0 = arith.constant 0 : i32
    %c0_i32_1 = arith.constant 0 : i32
    return %c0_i32, %c0_i32_0 : i32, i32
  }
}

</mosaic_0001>

<bundles_post_ra>
// kernel: model_forward.1
= control target key start
LH: loop header
LB: loop body
LE: loop exit
PB: predicated region body
PF: predicated region fallthrough
CT: control target
= control target key end

     0   :  { %s1004_s16 = smov 126   ;;  %s1005_s17 = smov 127   ;;  %v1012_v51 = vmov 0.0   ;;  %v1013_v52 = vmov 0   ;;  %vm28_vm0 = vcmask 1046528   ;;  %vm30_vm1 = vcmask 1039360   ;;  %s1390_s2 = inlined_call_operand.vmem [shape: f32[3,1152], index: 2, kind: input, shape index: {}]   ;;  %s1391_s1 = inlined_call_operand.vmem [shape: f32[16,1], index: 1, kind: input, shape index: {}]   ;;  %s1392_s0 = inlined_call_operand.vmem [shape: f32[16,27], index: 0, kind: input, shape index: {}]   ;;  %s1393_s3 = inlined_call_operand.vmem [shape: f32[16,1024], index: 3, kind: output, shape index: {}]  }
   0x1   :  { %v36_v0 = vld [vmem:[%s1390_s2] ss:$4 sm:$0xff]  ;;  %s1006_s26 = smov 95   ;;  %s1007_s4 = smov 94   ;;  %v902_v18 = vld [vmem:[%s1390_s2 + $0x1] ss:$4 sm:$0xff]  ;;  %565 = vmatprep.mubr.f32.mxu0 %v1012_v51  ;;  %642 = vmatprep.mubr.f32.mxu1 %v1012_v51 }
   0x2   :  { %v17_v1 = vld [vmem:[%s1390_s2] ss:$4 sm:$0xff]  ;;  %40 = vrot.lane.b32.xlu1 %v36_v0, %s1004_s16  ;;  %s1008_s9 = smov 93   ;;  %s1009_s14 = smov 62   ;;  %v904_v20 = vld [vmem:[%s1390_s2 + $0x1] ss:$4 sm:$0xff]  ;;  %1002 = vset.pattern.permute.xlu0 %v1013_v52 }
   0x3   :  { %22 = vrot.lane.b32.xlu0 %v17_v1, %s1005_s17  ;;  %v894_v2 = vld [vmem:[%s1390_s2 + $0x20] ss:$4 sm:$0x1]  ;;  %s1010_s23 = smov 61   ;;  %s1011_s29 = smov 60   ;;  %1003 = vset.pattern.permute.xlu1 %v1013_v52  ;;  %v458_v54 = vld [vmem:[%s1391_s1 + $0x8] sm:$0xff] }
   0x4   :  { %v893_v3 = vld [vmem:[%s1390_s2 + $0x20] ss:$4 sm:$0x1]  ;;  %v903_v17 = vld [vmem:[%s1390_s2 + $0x21] ss:$4 sm:$0x1] }
   0x5   :  { %v895_v4 = vld [vmem:[%s1390_s2 + $0x20] ss:$4 sm:$0x1]  ;;  %v905_v19 = vld [vmem:[%s1390_s2 + $0x21] ss:$4 sm:$0x1] }
   0x6   :  { %42 = vrot.lane.b32.xlu1 %v894_v2, %s1004_s16  ;;  %v53_v5 = vld [vmem:[%s1390_s2] ss:$4 sm:$0xff]  ;;  %v907_v21 = vld [vmem:[%s1390_s2 + $0x21] ss:$4 sm:$0x1]  ;;  %vm47_vm2 = vcmask 1031168  }
   0x7   :  { %24 = vrot.lane.b32.xlu0 %v893_v3, %s1005_s17  ;;  %v896_v6 = vld [vmem:[%s1390_s2 + $0x20] ss:$4 sm:$0x1]  ;;  %v906_v22 = vld [vmem:[%s1390_s2 + $0x1] ss:$4 sm:$0xff]  ;;  %vm64_vm3 = vcmask 777216  }
   0x8   :  { %v70_v7 = vld [vmem:[%s1390_s2] ss:$4 sm:$0xff]  ;;  %v909_v23 = vld [vmem:[%s1390_s2 + $0x21] ss:$4 sm:$0x1]  ;;  %vm81_vm4 = vcmask 769024  }
   0x9   :  { %v897_v8 = vld [vmem:[%s1390_s2 + $0x20] ss:$4 sm:$0x1]  ;;  %v908_v24 = vld [vmem:[%s1390_s2 + $0x1] ss:$4 sm:$0xff]  ;;  %vm98_vm5 = vcmask 760832  }
   0xa   :  { %59 = vrot.lane.b32.xlu1 %v895_v4, %s1006_s26  ;;  %v87_v9 = vld [vmem:[%s1390_s2] ss:$4 sm:$0xff]  ;;  %v901_v25 = vld [vmem:[%s1390_s2 + $0x1] ss:$4 sm:$0xff]  ;;  %v919_v35 = vld [vmem:[%s1390_s2 + $0x2] ss:$4 sm:$0xff] }
   0xb   :  { %57 = vrot.lane.b32.xlu0 %v53_v5, %s1006_s26  ;;  %v898_v10 = vld [vmem:[%s1390_s2 + $0x20] ss:$4 sm:$0x1]  ;;  %158 = vst [vmem:[#allocation2 + $0x41] ss:$8 sm:$0xf] %v901_v25 }
   0xc   :  { %v104_v11 = vld [vmem:[%s1390_s2] ss:$4 sm:$0xff]  ;;  %159 = vst [vmem:[#allocation2 + $0x41] ss:$8 sm:$0xf0] %v901_v25  ;;  %vm115_vm6 = vcmask 506880  }
   0xd   :  { %v899_v12 = vld [vmem:[%s1390_s2 + $0x20] ss:$4 sm:$0x1]  ;;  %v911_v26 = vld [vmem:[%s1390_s2 + $0x21] ss:$4 sm:$0x1] }
   0xe   :  { %76 = vrot.lane.b32.xlu1 %v896_v6, %s1007_s4  ;;  %v121_v13 = vld [vmem:[%s1390_s2] ss:$4 sm:$0xff]  ;;  %v910_v27 = vld [vmem:[%s1390_s2 + $0x1] ss:$4 sm:$0xff]  ;;  %v921_v37 = vld [vmem:[%s1390_s2 + $0x2] ss:$4 sm:$0xff] }
   0xf   :  { %74 = vrot.lane.b32.xlu0 %v70_v7, %s1007_s4  ;;  %v14_v14 = vld [vmem:[%s1390_s2] ss:$4 sm:$0xff]  ;;  %v913_v28 = vld [vmem:[%s1390_s2 + $0x21] ss:$4 sm:$0x1]  ;;  %vm132_vm7 = vcmask 498688  }
  0x10   :  { %15 = vst [vmem:[#allocation2] ss:$8 sm:$0xf] %v14_v14  ;;  %16 = vst [vmem:[#allocation2] ss:$8 sm:$0xf0] %v14_v14 }
  0x11   :  { %v900_v15 = vld [vmem:[%s1390_s2 + $0x20] ss:$4 sm:$0x1]  ;;  %v912_v29 = vld [vmem:[%s1390_s2 + $0x1] ss:$4 sm:$0xff]  ;;  %vm149_vm8 = vcmask 490496  }
  0x12   :  { %93 = vrot.lane.b32.xlu1 %v897_v8, %s1008_s9  ;;  %v138_v16 = vld [vmem:[%s1390_s2] ss:$4 sm:$0xff]  ;;  %v915_v30 = vld [vmem:[%s1390_s2 + $0x21] ss:$4 sm:$0x1]  ;;  %vm476_vm9 = vcmask 1042432  }
  0x13   :  { %91 = vrot.lane.b32.xlu0 %v87_v9, %s1008_s9  ;;  %v914_v31 = vld [vmem:[%s1390_s2 + $0x1] ss:$4 sm:$0xff]  ;;  %v920_v34 = vld [vmem:[%s1390_s2 + $0x22] ss:$4 sm:$0x1]  ;;  %vm1014_vm10 = vmmov 1  }
  0x14   :  { %v917_v32 = vld [vmem:[%s1390_s2 + $0x21] ss:$4 sm:$0x1]  ;;  %v922_v36 = vld [vmem:[%s1390_s2 + $0x22] ss:$4 sm:$0x1]  ;;  %vm1292_vm11 = vmpackc.low %vm476_vm9, %vm1014_vm10 }
  0x15   :  { %v916_v33 = vld [vmem:[%s1390_s2 + $0x1] ss:$4 sm:$0xff]  ;;  %v924_v38 = vld [vmem:[%s1390_s2 + $0x22] ss:$4 sm:$0x1]  ;;  %vm469_vm12 = vcmask 220160  }
  0x16   :  { %110 = vrot.lane.b32.xlu1 %v898_v10, %s1009_s14  ;;  %v923_v39 = vld [vmem:[%s1390_s2 + $0x2] ss:$4 sm:$0xff] }
  0x17   :  { %108 = vrot.lane.b32.xlu0 %v104_v11, %s1009_s14  ;;  %v918_v40 = vld [vmem:[%s1390_s2 + $0x2] ss:$4 sm:$0xff] }
  0x18   :  { %292 = vst [vmem:[#allocation2 + $0x82] ss:$8 sm:$0xf] %v918_v40  ;;  %293 = vst [vmem:[#allocation2 + $0x82] ss:$8 sm:$0xf0] %v918_v40 }
  0x19   :  { %v926_v41 = vld [vmem:[%s1390_s2 + $0x22] ss:$4 sm:$0x1] }
  0x1a   :  { %127 = vrot.lane.b32.xlu1 %v899_v12, %s1010_s23  ;;  %v925_v42 = vld [vmem:[%s1390_s2 + $0x2] ss:$4 sm:$0xff] }
  0x1b   :  { %125 = vrot.lane.b32.xlu0 %v121_v13, %s1010_s23  ;;  %v928_v43 = vld [vmem:[%s1390_s2 + $0x22] ss:$4 sm:$0x1] }
  0x1c   :  { %v927_v44 = vld [vmem:[%s1390_s2 + $0x2] ss:$4 sm:$0xff] }
  0x1d   :  { %v930_v45 = vld [vmem:[%s1390_s2 + $0x22] ss:$4 sm:$0x1] }
  0x1e   :  { %144 = vrot.lane.b32.xlu1 %v900_v15, %s1011_s29  ;;  %v929_v46 = vld [vmem:[%s1390_s2 + $0x2] ss:$4 sm:$0xff] }
  0x1f   :  { %142 = vrot.lane.b32.xlu0 %v138_v16, %s1011_s29  ;;  %v932_v47 = vld [vmem:[%s1390_s2 + $0x22] ss:$4 sm:$0x1] }
  0x20   :  { %v931_v48 = vld [vmem:[%s1390_s2 + $0x2] ss:$4 sm:$0xff] }
  0x21   :  { %v934_v49 = vld [vmem:[%s1390_s2 + $0x22] ss:$4 sm:$0x1] }
  0x22   :  { %167 = vrot.lane.b32.xlu1 %v903_v17, %s1005_s17  ;;  %v933_v50 = vld [vmem:[%s1390_s2 + $0x2] ss:$4 sm:$0xff] }
  0x23   :  { %165 = vrot.lane.b32.xlu0 %v902_v18, %s1005_s17  ;;  %v457_v53 = vld [vmem:[%s1391_s1] sm:$0xff] }
  0x26   :  { %183 = vrot.lane.b32.xlu1 %v905_v19, %s1004_s16 }
  0x27   :  { %181 = vrot.lane.b32.xlu0 %v904_v20, %s1004_s16 }
  0x2a   :  { %199 = vrot.lane.b32.xlu1 %v907_v21, %s1006_s26 }
  0x2b   :  { %197 = vrot.lane.b32.xlu0 %v906_v22, %s1006_s26 }
  0x2e   :  { %215 = vrot.lane.b32.xlu1 %v909_v23, %s1007_s4 }
  0x2f   :  { %213 = vrot.lane.b32.xlu0 %v908_v24, %s1007_s4 }
  0x32   :  { %231 = vrot.lane.b32.xlu1 %v911_v26, %s1008_s9 }
  0x33   :  { %229 = vrot.lane.b32.xlu0 %v910_v27, %s1008_s9 }
  0x36   :  { %247 = vrot.lane.b32.xlu1 %v913_v28, %s1009_s14 }
  0x37   :  { %245 = vrot.lane.b32.xlu0 %v912_v29, %s1009_s14 }
  0x3a   :  { %263 = vrot.lane.b32.xlu1 %v915_v30, %s1010_s23 }
  0x3b   :  { %261 = vrot.lane.b32.xlu0 %v914_v31, %s1010_s23 }
  0x3e   :  { %279 = vrot.lane.b32.xlu1 %v917_v32, %s1011_s29 }
  0x3f   :  { %277 = vrot.lane.b32.xlu0 %v916_v33, %s1011_s29 }
  0x42   :  { %301 = vrot.lane.b32.xlu1 %v920_v34, %s1005_s17 }
  0x43   :  { %299 = vrot.lane.b32.xlu0 %v919_v35, %s1005_s17 }
  0x46   :  { %317 = vrot.lane.b32.xlu1 %v922_v36, %s1004_s16 }
  0x47   :  { %315 = vrot.lane.b32.xlu0 %v921_v37, %s1004_s16 }
  0x4a   :  { %333 = vrot.lane.b32.xlu1 %v924_v38, %s1006_s26 }
  0x4b   :  { %331 = vrot.lane.b32.xlu0 %v923_v39, %s1006_s26 }
  0x4e   :  { %349 = vrot.lane.b32.xlu1 %v926_v41, %s1007_s4 }
  0x4f   :  { %347 = vrot.lane.b32.xlu0 %v925_v42, %s1007_s4 }
  0x52   :  { %365 = vrot.lane.b32.xlu1 %v928_v43, %s1008_s9 }
  0x53   :  { %363 = vrot.lane.b32.xlu0 %v927_v44, %s1008_s9 }
  0x56   :  { %381 = vrot.lane.b32.xlu1 %v930_v45, %s1009_s14 }
  0x57   :  { %379 = vrot.lane.b32.xlu0 %v929_v46, %s1009_s14 }
  0x5a   :  { %397 = vrot.lane.b32.xlu1 %v932_v47, %s1010_s23 }
  0x5b   :  { %395 = vrot.lane.b32.xlu0 %v931_v48, %s1010_s23 }
  0x5e   :  { %413 = vrot.lane.b32.xlu1 %v934_v49, %s1011_s29 }
  0x5f   :  { %411 = vrot.lane.b32.xlu0 %v933_v50, %s1011_s29 }
  0x62   :  { %466 = vperm.xlu1 %1003, %v458_v54  }
  0x63   :  { %461 = vperm.xlu0 %1002, %v457_v53  }
  0x74   :  { %v41_v55 = vpop.permute.xlu1 %40 }
  0x75   :  { %v23_v56 = vpop.permute.xlu0 %22  ;;  %v44_v59 = vrot.slane %v41_v55, 1 }
  0x76   :  { %v26_v60 = vrot.slane %v23_v56, 1 }
  0x78   :  { %v43_v57 = vpop.permute.xlu1 %42 }
  0x79   :  { %v25_v58 = vpop.permute.xlu0 %24  ;;  %v45_v61 = vrot.slane %v43_v57, 1 }
  0x7a   :  { %v27_v62 = vrot.slane %v25_v58, 1 }
  0x7b   :  { %v46_v63 = vsel %vm28_vm0, %v44_v59, %v45_v61 }
  0x7c   :  { %v29_v0 = vsel %vm28_vm0, %v26_v60, %v27_v62  ;;  %v60_v1 = vpop.permute.xlu1 %59  ;;  %v48_v4 = vsel %vm47_vm2, %v41_v55, %v46_v63 }
  0x7d   :  { %v58_v2 = vpop.permute.xlu0 %57  ;;  %v31_v3 = vsel %vm30_vm1, %v23_v56, %v29_v0  ;;  %v62_v5 = vrot.slane %v60_v1, 1  ;;  %51 = vst [vmem:[#allocation2 + $0x2] ss:$8 sm:$0xf] %v48_v4 }
  0x7e   :  { %v61_v6 = vrot.slane %v58_v2, 1  ;;  %34 = vst [vmem:[#allocation2 + $0x1] ss:$8 sm:$0xf] %v31_v3 }
  0x7f   :  { %35 = vst [vmem:[#allocation2 + $0x1] ss:$8 sm:$0xf0] %v31_v3  ;;  %52 = vst [vmem:[#allocation2 + $0x2] ss:$8 sm:$0xf0] %v48_v4 }
  0x80   :  { %v63_v7 = vsel %vm28_vm0, %v61_v6, %v62_v5  ;;  %v77_v9 = vpop.permute.xlu1 %76 }
  0x81   :  { %v65_v8 = vsel %vm64_vm3, %v58_v2, %v63_v7  ;;  %v75_v10 = vpop.permute.xlu0 %74  ;;  %v79_v11 = vrot.slane %v77_v9, 1 }
  0x82   :  { %68 = vst [vmem:[#allocation2 + $0x3] ss:$8 sm:$0xf] %v65_v8  ;;  %69 = vst [vmem:[#allocation2 + $0x3] ss:$8 sm:$0xf0] %v65_v8 }
  0x83   :  { %v78_v12 = vrot.slane %v75_v10, 1 }
  0x84   :  { %v94_v15 = vpop.permute.xlu1 %93 }
  0x85   :  { %v80_v13 = vsel %vm28_vm0, %v78_v12, %v79_v11  ;;  %v92_v16 = vpop.permute.xlu0 %91  ;;  %v96_v17 = vrot.slane %v94_v15, 1 }
  0x86   :  { %v82_v14 = vsel %vm81_vm4, %v75_v10, %v80_v13  ;;  %v95_v18 = vrot.slane %v92_v16, 1 }
  0x87   :  { %85 = vst [vmem:[#allocation2 + $0x4] ss:$8 sm:$0xf] %v82_v14  ;;  %86 = vst [vmem:[#allocation2 + $0x4] ss:$8 sm:$0xf0] %v82_v14 }
  0x88   :  { %v97_v19 = vsel %vm28_vm0, %v95_v18, %v96_v17  ;;  %v111_v21 = vpop.permute.xlu1 %110 }
  0x89   :  { %v99_v20 = vsel %vm98_vm5, %v92_v16, %v97_v19  ;;  %v109_v22 = vpop.permute.xlu0 %108  ;;  %v113_v23 = vrot.slane %v111_v21, 1 }
  0x8a   :  { %102 = vst [vmem:[#allocation2 + $0x5] ss:$8 sm:$0xf] %v99_v20  ;;  %103 = vst [vmem:[#allocation2 + $0x5] ss:$8 sm:$0xf0] %v99_v20 }
  0x8b   :  { %v112_v24 = vrot.slane %v109_v22, 1 }
  0x8c   :  { %v128_v27 = vpop.permute.xlu1 %127 }
  0x8d   :  { %v114_v25 = vsel %vm28_vm0, %v112_v24, %v113_v23  ;;  %v126_v28 = vpop.permute.xlu0 %125  ;;  %v130_v29 = vrot.slane %v128_v27, 1 }
  0x8e   :  { %v116_v26 = vsel %vm115_vm6, %v109_v22, %v114_v25  ;;  %v129_v30 = vrot.slane %v126_v28, 1 }
  0x8f   :  { %119 = vst [vmem:[#allocation2 + $0x6] ss:$8 sm:$0xf] %v116_v26  ;;  %120 = vst [vmem:[#allocation2 + $0x6] ss:$8 sm:$0xf0] %v116_v26 }
  0x90   :  { %v131_v31 = vsel %vm28_vm0, %v129_v30, %v130_v29  ;;  %v145_v33 = vpop.permute.xlu1 %144 }
  0x91   :  { %v133_v32 = vsel %vm132_vm7, %v126_v28, %v131_v31  ;;  %v143_v34 = vpop.permute.xlu0 %142  ;;  %v147_v35 = vrot.slane %v145_v33, 1 }
  0x92   :  { %136 = vst [vmem:[#allocation2 + $0x7] ss:$8 sm:$0xf] %v133_v32  ;;  %137 = vst [vmem:[#allocation2 + $0x7] ss:$8 sm:$0xf0] %v133_v32 }
  0x93   :  { %v146_v36 = vrot.slane %v143_v34, 1 }
  0x94   :  { %v168_v39 = vpop.permute.xlu1 %167 }
  0x95   :  { %v148_v37 = vsel %vm28_vm0, %v146_v36, %v147_v35  ;;  %v166_v40 = vpop.permute.xlu0 %165  ;;  %v170_v41 = vrot.slane %v168_v39, 1 }
  0x96   :  { %v150_v38 = vsel %vm149_vm8, %v143_v34, %v148_v37  ;;  %v169_v42 = vrot.slane %v166_v40, 1 }
  0x97   :  { %153 = vst [vmem:[#allocation2 + $0x40] ss:$8 sm:$0xf] %v150_v38  ;;  %154 = vst [vmem:[#allocation2 + $0x40] ss:$8 sm:$0xf0] %v150_v38 }
  0x98   :  { %v171_v43 = vsel %vm28_vm0, %v169_v42, %v170_v41  ;;  %v184_v45 = vpop.permute.xlu1 %183 }
  0x99   :  { %v172_v44 = vsel %vm30_vm1, %v166_v40, %v171_v43  ;;  %v182_v46 = vpop.permute.xlu0 %181  ;;  %v186_v47 = vrot.slane %v184_v45, 1  ;;  %v426_v23 = vld [vmem:[#allocation2 + $0x8] sm:$0xff]  ;;  %v428_v24 = vld [vmem:[#allocation2 + $0x18] sm:$0xff]  ;;  %v425_v35 = vld [vmem:[#allocation2] sm:$0xff] }
  0x9a   :  { %175 = vst [vmem:[#allocation2 + $0x42] ss:$8 sm:$0xf] %v172_v44  ;;  %176 = vst [vmem:[#allocation2 + $0x42] ss:$8 sm:$0xf0] %v172_v44 }
  0x9b   :  { %v185_v48 = vrot.slane %v182_v46, 1  ;;  %v427_v36 = vld [vmem:[#allocation2 + $0x10] sm:$0xff] }
  0x9c   :  { %v200_v52 = vpop.permute.xlu1 %199 }
  0x9d   :  { %v187_v49 = vsel %vm28_vm0, %v185_v48, %v186_v47  ;;  %v198_v53 = vpop.permute.xlu0 %197  ;;  %v202_v54 = vrot.slane %v200_v52, 1 }
  0x9e   :  { %v188_v50 = vsel %vm47_vm2, %v182_v46, %v187_v49  ;;  %v201_v55 = vrot.slane %v198_v53, 1 }
  0x9f   :  { %191 = vst [vmem:[#allocation2 + $0x43] ss:$8 sm:$0xf] %v188_v50  ;;  %192 = vst [vmem:[#allocation2 + $0x43] ss:$8 sm:$0xf0] %v188_v50 }
  0xa0   :  { %v203_v56 = vsel %vm28_vm0, %v201_v55, %v202_v54  ;;  %v216_v58 = vpop.permute.xlu1 %215 }
  0xa1   :  { %v204_v57 = vsel %vm64_vm3, %v198_v53, %v203_v56  ;;  %v214_v59 = vpop.permute.xlu0 %213  ;;  %v218_v60 = vrot.slane %v216_v58, 1 }
  0xa2   :  { %207 = vst [vmem:[#allocation2 + $0x44] ss:$8 sm:$0xf] %v204_v57  ;;  %208 = vst [vmem:[#allocation2 + $0x44] ss:$8 sm:$0xf0] %v204_v57 }
  0xa3   :  { %v217_v61 = vrot.slane %v214_v59, 1 }
  0xa4   :  { %v232_v0 = vpop.permute.xlu1 %231 }
  0xa5   :  { %v219_v62 = vsel %vm28_vm0, %v217_v61, %v218_v60  ;;  %v230_v1 = vpop.permute.xlu0 %229  ;;  %v234_v2 = vrot.slane %v232_v0, 1 }
  0xa6   :  { %v220_v63 = vsel %vm81_vm4, %v214_v59, %v219_v62  ;;  %v233_v3 = vrot.slane %v230_v1, 1 }
  0xa7   :  { %223 = vst [vmem:[#allocation2 + $0x45] ss:$8 sm:$0xf] %v220_v63  ;;  %224 = vst [vmem:[#allocation2 + $0x45] ss:$8 sm:$0xf0] %v220_v63 }
  0xa8   :  { %v235_v4 = vsel %vm28_vm0, %v233_v3, %v234_v2  ;;  %v248_v6 = vpop.permute.xlu1 %247 }
  0xa9   :  { %v236_v5 = vsel %vm98_vm5, %v230_v1, %v235_v4  ;;  %v246_v7 = vpop.permute.xlu0 %245  ;;  %v250_v8 = vrot.slane %v248_v6, 1 }
  0xaa   :  { %239 = vst [vmem:[#allocation2 + $0x46] ss:$8 sm:$0xf] %v236_v5  ;;  %240 = vst [vmem:[#allocation2 + $0x46] ss:$8 sm:$0xf0] %v236_v5 }
  0xab   :  { %v249_v9 = vrot.slane %v246_v7, 1 }
  0xac   :  { %v264_v12 = vpop.permute.xlu1 %263 }
  0xad   :  { %v251_v10 = vsel %vm28_vm0, %v249_v9, %v250_v8  ;;  %v262_v13 = vpop.permute.xlu0 %261  ;;  %v266_v14 = vrot.slane %v264_v12, 1 }
  0xae   :  { %v252_v11 = vsel %vm115_vm6, %v246_v7, %v251_v10  ;;  %v265_v15 = vrot.slane %v262_v13, 1 }
  0xaf   :  { %255 = vst [vmem:[#allocation2 + $0x47] ss:$8 sm:$0xf] %v252_v11  ;;  %256 = vst [vmem:[#allocation2 + $0x47] ss:$8 sm:$0xf0] %v252_v11 }
  0xb0   :  { %v267_v16 = vsel %vm28_vm0, %v265_v15, %v266_v14  ;;  %v280_v18 = vpop.permute.xlu1 %279 }
  0xb1   :  { %v268_v17 = vsel %vm132_vm7, %v262_v13, %v267_v16  ;;  %v278_v19 = vpop.permute.xlu0 %277  ;;  %v282_v20 = vrot.slane %v280_v18, 1 }
  0xb2   :  { %271 = vst [vmem:[#allocation2 + $0x80] ss:$8 sm:$0xf] %v268_v17  ;;  %272 = vst [vmem:[#allocation2 + $0x80] ss:$8 sm:$0xf0] %v268_v17 }
  0xb3   :  { %v281_v21 = vrot.slane %v278_v19, 1 }
  0xb4   :  { %v302_v26 = vpop.permute.xlu1 %301 }
  0xb5   :  { %v283_v22 = vsel %vm28_vm0, %v281_v21, %v282_v20  ;;  %v300_v27 = vpop.permute.xlu0 %299  ;;  %v304_v31 = vrot.slane %v302_v26, 1 }
  0xb6   :  { %v284_v25 = vsel %vm149_vm8, %v278_v19, %v283_v22  ;;  %v434_v28 = vld [vmem:[#allocation2 + $0x48] sm:$0xff]  ;;  %v436_v29 = vld [vmem:[#allocation2 + $0x58] sm:$0xff]  ;;  %v433_v30 = vld [vmem:[#allocation2 + $0x40] sm:$0xff]  ;;  %v303_v32 = vrot.slane %v300_v27, 1 }
  0xb7   :  { %287 = vst [vmem:[#allocation2 + $0x81] ss:$8 sm:$0xf] %v284_v25  ;;  %288 = vst [vmem:[#allocation2 + $0x81] ss:$8 sm:$0xf0] %v284_v25  ;;  %v951_v33 = vpack.c.bf16 %v434_v28, %v426_v23  ;;  %v961_v34 = vpack.c.bf16 %v436_v29, %v428_v24  ;;  %v953_v38 = vpack.c.bf16 %v433_v30, %v425_v35 }
  0xb8   :  { %v435_v37 = vld [vmem:[#allocation2 + $0x50] sm:$0xff]  ;;  %v305_v40 = vsel %vm28_vm0, %v303_v32, %v304_v31  ;;  %v318_v42 = vpop.permute.xlu1 %317  ;;  %v438_v22 = vld [vmem:[#allocation2 + $0x68] sm:$0xff]  ;;  %v440_v23 = vld [vmem:[#allocation2 + $0x78] sm:$0xff] }
  0xb9   :  { %v963_v39 = vpack.c.bf16 %v435_v37, %v427_v36  ;;  %952 = vmatprep.subr.bf16.mxu0 %v951_v33  ;;  %962 = vmatprep.subr.bf16.mxu1 %v961_v34  ;;  %v306_v41 = vsel %vm30_vm1, %v300_v27, %v305_v40  ;;  %v316_v43 = vpop.permute.xlu0 %315  ;;  %v320_v44 = vrot.slane %v318_v42, 1  ;;  %v430_v36 = vld [vmem:[#allocation2 + $0x28] sm:$0xff]  ;;  %v432_v37 = vld [vmem:[#allocation2 + $0x38] sm:$0xff]  ;;  %v437_v40 = vld [vmem:[#allocation2 + $0x60] sm:$0xff] }
  0xba   :  { %954 = vmatpush1.bf16.msra.mxu0 %v953_v38  ;;  %309 = vst [vmem:[#allocation2 + $0x83] ss:$8 sm:$0xf] %v306_v41  ;;  %310 = vst [vmem:[#allocation2 + $0x83] ss:$8 sm:$0xf0] %v306_v41  ;;  %v971_v38 = vpack.c.bf16 %v438_v22, %v430_v36 }
  0xbb   :  { %964 = vmatpush1.bf16.msra.mxu1 %v963_v39  ;;  %v319_v45 = vrot.slane %v316_v43, 1  ;;  %v981_v39 = vpack.c.bf16 %v440_v23, %v432_v37  ;;  %v439_v41 = vld [vmem:[#allocation2 + $0x70] sm:$0xff]  ;;  %v423_v42 = vld [vmem:[%s1392_s0] sm:$0xff] }
  0xbc   :  { %v334_v48 = vpop.permute.xlu1 %333 }
  0xbd   :  { %v321_v46 = vsel %vm28_vm0, %v319_v45, %v320_v44  ;;  %v332_v49 = vpop.permute.xlu0 %331  ;;  %v336_v50 = vrot.slane %v334_v48, 1  ;;  %v429_v45 = vld [vmem:[#allocation2 + $0x20] sm:$0xff] }
  0xbe   :  { %v322_v47 = vsel %vm47_vm2, %v316_v43, %v321_v46  ;;  %v335_v52 = vrot.slane %v332_v49, 1  ;;  %v431_v46 = vld [vmem:[#allocation2 + $0x30] sm:$0xff] }
  0xbf   :  { %325 = vst [vmem:[#allocation2 + $0x84] ss:$8 sm:$0xf] %v322_v47  ;;  %326 = vst [vmem:[#allocation2 + $0x84] ss:$8 sm:$0xf0] %v322_v47  ;;  %v973_v47 = vpack.c.bf16 %v437_v40, %v429_v45  ;;  %v983_v48 = vpack.c.bf16 %v439_v41, %v431_v46 }
  0xc0   :  { %v337_v53 = vsel %vm28_vm0, %v335_v52, %v336_v50  ;;  %v350_v55 = vpop.permute.xlu1 %349 }
  0xc1   :  { %v338_v54 = vsel %vm64_vm3, %v332_v49, %v337_v53  ;;  %v348_v56 = vpop.permute.xlu0 %347  ;;  %v352_v57 = vrot.slane %v350_v55, 1 }
  0xc2   :  { %341 = vst [vmem:[#allocation2 + $0x85] ss:$8 sm:$0xf] %v338_v54  ;;  %342 = vst [vmem:[#allocation2 + $0x85] ss:$8 sm:$0xf0] %v338_v54 }
  0xc3   :  { %v351_v58 = vrot.slane %v348_v56, 1 }
  0xc4   :  { %v366_v61 = vpop.permute.xlu1 %365 }
  0xc5   :  { %v353_v59 = vsel %vm28_vm0, %v351_v58, %v352_v57  ;;  %v364_v62 = vpop.permute.xlu0 %363  ;;  %v368_v63 = vrot.slane %v366_v61, 1 }
  0xc6   :  { %v354_v60 = vsel %vm81_vm4, %v348_v56, %v353_v59  ;;  %v367_v0 = vrot.slane %v364_v62, 1  ;;  %v424_v56 = vld [vmem:[%s1392_s0 + $0x8] sm:$0xff] }
  0xc7   :  { %357 = vst [vmem:[#allocation2 + $0x86] ss:$8 sm:$0xf] %v354_v60  ;;  %358 = vst [vmem:[#allocation2 + $0x86] ss:$8 sm:$0xf0] %v354_v60 }
  0xc8   :  { %v369_v1 = vsel %vm28_vm0, %v367_v0, %v368_v63  ;;  %v382_v3 = vpop.permute.xlu1 %381 }
  0xc9   :  { %v370_v2 = vsel %vm98_vm5, %v364_v62, %v369_v1  ;;  %v380_v4 = vpop.permute.xlu0 %379  ;;  %v384_v5 = vrot.slane %v382_v3, 1 }
  0xca   :  { %373 = vst [vmem:[#allocation2 + $0x87] ss:$8 sm:$0xf] %v370_v2  ;;  %374 = vst [vmem:[#allocation2 + $0x87] ss:$8 sm:$0xf0] %v370_v2 }
  0xcb   :  { %v383_v6 = vrot.slane %v380_v4, 1 }
  0xcc   :  { %v398_v9 = vpop.permute.xlu1 %397 }
  0xcd   :  { %v385_v7 = vsel %vm28_vm0, %v383_v6, %v384_v5  ;;  %v396_v10 = vpop.permute.xlu0 %395  ;;  %v400_v11 = vrot.slane %v398_v9, 1 }
  0xce   :  { %v386_v8 = vsel %vm115_vm6, %v380_v4, %v385_v7  ;;  %v399_v12 = vrot.slane %v396_v10, 1 }
  0xcf   :  { %389 = vst [vmem:[#allocation2 + $0xc0] ss:$8 sm:$0xf] %v386_v8  ;;  %390 = vst [vmem:[#allocation2 + $0xc0] ss:$8 sm:$0xf0] %v386_v8 }
  0xd0   :  { %v401_v13 = vsel %vm28_vm0, %v399_v12, %v400_v11  ;;  %v414_v15 = vpop.permute.xlu1 %413 }
  0xd1   :  { %v402_v14 = vsel %vm132_vm7, %v396_v10, %v401_v13  ;;  %v412_v16 = vpop.permute.xlu0 %411  ;;  %v416_v17 = vrot.slane %v414_v15, 1  ;;  %v442_v24 = vld [vmem:[#allocation2 + $0x88] sm:$0xff]  ;;  %v444_v25 = vld [vmem:[#allocation2 + $0x98] sm:$0xff]  ;;  %v441_v26 = vld [vmem:[#allocation2 + $0x80] sm:$0xff] }
  0xd2   :  { %405 = vst [vmem:[#allocation2 + $0xc1] ss:$8 sm:$0xf] %v402_v14  ;;  %406 = vst [vmem:[#allocation2 + $0xc1] ss:$8 sm:$0xf0] %v402_v14 }
  0xd3   :  { %v415_v18 = vrot.slane %v412_v16, 1  ;;  %v443_v33 = vld [vmem:[#allocation2 + $0x90] sm:$0xff]  ;;  %v446_v49 = vld [vmem:[#allocation2 + $0xa8] sm:$0xff]  ;;  %v448_v50 = vld [vmem:[#allocation2 + $0xb8] sm:$0xff] }
  0xd4   :  { %v445_v57 = vld [vmem:[#allocation2 + $0xa0] sm:$0xff]  ;;  %v447_v58 = vld [vmem:[#allocation2 + $0xb0] sm:$0xff] }
  0xd5   :  { %v417_v19 = vsel %vm28_vm0, %v415_v18, %v416_v17 }
  0xd6   :  { %v418_v20 = vsel %vm149_vm8, %v412_v16, %v417_v19 }
  0xd7   :  { %421 = vst [vmem:[#allocation2 + $0xc2] ss:$8 sm:$0xf] %v418_v20  ;;  %422 = vst [vmem:[#allocation2 + $0xc2] ss:$8 sm:$0xf0] %v418_v20 }
  0xde   :  { %v450_v27 = vld [vmem:[#allocation2 + $0xc8] sm:$0x7]  ;;  %v452_v28 = vld [vmem:[#allocation2 + $0xd8] sm:$0x7]  ;;  %v449_v29 = vld [vmem:[#allocation2 + $0xc0] sm:$0x7] }
  0xdf   :  { %v955_v30 = vpack.c.bf16 %v450_v27, %v442_v24  ;;  %v965_v31 = vpack.c.bf16 %v452_v28, %v444_v25  ;;  %v958_v32 = vpack.c.bf16 %v449_v29, %v441_v26  ;;  %v451_v34 = vld [vmem:[#allocation2 + $0xd0] sm:$0x7]  ;;  %v454_v43 = vld [vmem:[#allocation2 + $0xe8] sm:$0x7]  ;;  %v456_v44 = vld [vmem:[#allocation2 + $0xf8] sm:$0x7] }
  0xe0   :  { %v968_v35 = vpack.c.bf16 %v451_v34, %v443_v33  ;;  %v975_v52 = vpack.c.bf16 %v454_v43, %v446_v49  ;;  %v985_v53 = vpack.c.bf16 %v456_v44, %v448_v50  ;;  %v453_v54 = vld [vmem:[#allocation2 + $0xe0] sm:$0x7]  ;;  %v455_v55 = vld [vmem:[#allocation2 + $0xf0] sm:$0x7] }
  0xe1   :  { %957 = vmatprep.subr.msk.bf16.mxu0 %vm1292_vm11, %v955_v30  ;;  %967 = vmatprep.subr.msk.bf16.mxu1 %vm1292_vm11, %v965_v31  ;;  %v978_v59 = vpack.c.bf16 %v453_v54, %v445_v57  ;;  %v988_v60 = vpack.c.bf16 %v455_v55, %v447_v58  ;;  %v1332_v6 = vpop.permute.xlu1 %466 }
  0xe2   :  { %960 = vmatpush1.bf16.msk.msra.mxu0 %vm1292_vm11, %v958_v32  ;;  %970 = vmatpush1.bf16.msk.msra.mxu1 %vm1292_vm11, %v968_v35  ;;  %v462_v61 = vpop.permute.xlu0 %461 }
  0xe3   :  { %972 = vmatprep.subr.bf16.mxu0 %v971_v38  ;;  %982 = vmatprep.subr.bf16.mxu1 %v981_v39 }
  0xe5   :  { %937 = vmatmul.mubr.msk.f32.vlgmr.msra.gmra.mrb[0].mxu0 %vm469_vm12, %v423_v42  ;;  %941 = vmatmul.mubr.msk.f32.vlgmr.msra.gmra.mrb[0].mxu1 %vm469_vm12, %v423_v42 }
  0xe6   :  { %974 = vmatpush1.bf16.msra.mxu0 %v973_v47  ;;  %984 = vmatpush1.bf16.msra.mxu1 %v983_v48 }
  0xe7   :  { %977 = vmatprep.subr.msk.bf16.mxu0 %vm1292_vm11, %v975_v52  ;;  %987 = vmatprep.subr.msk.bf16.mxu1 %vm1292_vm11, %v985_v53 }
  0xe8   :  { %571 = vmatprep.mubr.f32.mxu0 %v1012_v51  ;;  %648 = vmatprep.mubr.f32.mxu1 %v1012_v51 }
  0xe9   :  { %938 = vmatmul.mubr.msk.f32.gmra.mrb[2].mxu0 %vm469_vm12, %v424_v56  ;;  %942 = vmatmul.mubr.msk.f32.gmra.mrb[2].mxu1 %vm469_vm12, %v424_v56 }
  0xea   :  { %980 = vmatpush1.bf16.msk.msra.mxu0 %vm1292_vm11, %v978_v59  ;;  %990 = vmatpush1.bf16.msk.msra.mxu1 %vm1292_vm11, %v988_v60 }
  0xeb   :  { %719 = vmatprep.mubr.f32.mxu0 %v1012_v51  ;;  %796 = vmatprep.mubr.f32.mxu1 %v1012_v51 }
  0xed   :  { %945 = vmatmul.mubr.msk.f32.vlgmr.msra.gmra.mrb[4].mxu0 %vm469_vm12, %v423_v42  ;;  %949 = vmatmul.mubr.msk.f32.vlgmr.msra.gmra.mrb[4].mxu1 %vm469_vm12, %v423_v42 }
  0xee   :  { %725 = vmatprep.mubr.f32.mxu0 %v1012_v51  ;;  %802 = vmatprep.mubr.f32.mxu1 %v1012_v51 }
  0xf1   :  { %946 = vmatmul.mubr.msk.f32.gmra.mrb[6].mxu0 %vm469_vm12, %v424_v56  ;;  %950 = vmatmul.mubr.msk.f32.gmra.mrb[6].mxu1 %vm469_vm12, %v424_v56 }
 0x1b8   :  { %v567_v62 = vpop.f32.mrb[0].mxu0  ;;  %v644_v63 = vpop.f32.mrb[0].mxu1 }
 0x1b9   :  { %v568_v0 = vadd.f32 %v567_v62, %v462_v61  ;;  %v645_v1 = vadd.f32 %v644_v63, %v462_v61  ;;  %v569_v2 = vpop.f32.mrb[1].mxu0  ;;  %v646_v3 = vpop.f32.mrb[1].mxu1 }
 0x1ba   :  { %v570_v4 = vadd.f32 %v569_v2, %v462_v61  ;;  %v647_v5 = vadd.f32 %v646_v3, %v462_v61 }
 0x1bb   :  { %v809_v7 = vadd.f32 3.0, %v568_v0  ;;  %v811_v8 = vadd.f32 3.0, %v645_v1 }
 0x1bc   :  { %v810_v9 = vadd.f32 3.0, %v570_v4  ;;  %v812_v10 = vadd.f32 3.0, %v647_v5  ;;  %v573_v51 = vpop.f32.mrb[2].mxu0  ;;  %v650_v11 = vpop.f32.mrb[2].mxu1 }
 0x1bd   :  { %v825_v12 = vmax.f32 %v809_v7, 0.0  ;;  %v827_v13 = vmax.f32 %v811_v8, 0.0  ;;  %v574_v14 = vadd.f32 %v573_v51, %v1332_v6  ;;  %v651_v15 = vadd.f32 %v650_v11, %v1332_v6  ;;  %v575_v16 = vpop.f32.mrb[3].mxu0  ;;  %v652_v17 = vpop.f32.mrb[3].mxu1 }
 0x1be   :  { %v826_v18 = vmax.f32 %v810_v9, 0.0  ;;  %v828_v19 = vmax.f32 %v812_v10, 0.0  ;;  %v576_v20 = vadd.f32 %v575_v16, %v1332_v6  ;;  %v653_v21 = vadd.f32 %v652_v17, %v1332_v6 }
 0x1bf   :  { %v841_v22 = vmin.f32 %v825_v12, 6.0  ;;  %v843_v23 = vmin.f32 %v827_v13, 6.0  ;;  %v817_v24 = vadd.f32 3.0, %v574_v14  ;;  %v819_v25 = vadd.f32 3.0, %v651_v15 }
 0x1c0   :  { %v842_v26 = vmin.f32 %v826_v18, 6.0  ;;  %v844_v27 = vmin.f32 %v828_v19, 6.0  ;;  %v818_v28 = vadd.f32 3.0, %v576_v20  ;;  %v820_v29 = vadd.f32 3.0, %v653_v21  ;;  %v721_v30 = vpop.f32.mrb[4].mxu0  ;;  %v798_v31 = vpop.f32.mrb[4].mxu1 }
 0x1c1   :  { %v857_v32 = vmul.f32 0.16666667, %v841_v22  ;;  %v859_v33 = vmul.f32 0.16666667, %v843_v23  ;;  %v833_v34 = vmax.f32 %v817_v24, 0.0  ;;  %v835_v35 = vmax.f32 %v819_v25, 0.0 }
 0x1c2   :  { %v858_v36 = vmul.f32 0.16666667, %v842_v26  ;;  %v860_v37 = vmul.f32 0.16666667, %v844_v27  ;;  %v834_v38 = vmax.f32 %v818_v28, 0.0  ;;  %v836_v39 = vmax.f32 %v820_v29, 0.0 }
 0x1c3   :  { %873 = vst [vmem:[%s1393_s3] sm:$0xff] %v857_v32  ;;  %875 = vst [vmem:[%s1393_s3 + $0x10] sm:$0xff] %v859_v33  ;;  %v849_v40 = vmin.f32 %v833_v34, 6.0  ;;  %v851_v41 = vmin.f32 %v835_v35, 6.0  ;;  %v722_v42 = vadd.f32 %v721_v30, %v462_v61  ;;  %v799_v43 = vadd.f32 %v798_v31, %v462_v61  ;;  %v723_v44 = vpop.f32.mrb[5].mxu0  ;;  %v800_v45 = vpop.f32.mrb[5].mxu1 }
 0x1c4   :  { %874 = vst [vmem:[%s1393_s3 + $0x8] sm:$0xff] %v858_v36  ;;  %876 = vst [vmem:[%s1393_s3 + $0x18] sm:$0xff] %v860_v37  ;;  %v850_v46 = vmin.f32 %v834_v38, 6.0  ;;  %v852_v47 = vmin.f32 %v836_v39, 6.0  ;;  %v724_v48 = vadd.f32 %v723_v44, %v462_v61  ;;  %v801_v49 = vadd.f32 %v800_v45, %v462_v61  ;;  %v727_v50 = vpop.f32.mrb[6].mxu0  ;;  %v804_v52 = vpop.f32.mrb[6].mxu1 }
 0x1c5   :  { %v865_v53 = vmul.f32 0.16666667, %v849_v40  ;;  %v867_v54 = vmul.f32 0.16666667, %v851_v41  ;;  %v813_v55 = vadd.f32 3.0, %v722_v42  ;;  %v815_v56 = vadd.f32 3.0, %v799_v43 }
 0x1c6   :  { %v866_v57 = vmul.f32 0.16666667, %v850_v46  ;;  %v868_v58 = vmul.f32 0.16666667, %v852_v47  ;;  %v814_v59 = vadd.f32 3.0, %v724_v48  ;;  %v816_v60 = vadd.f32 3.0, %v801_v49 }
 0x1c7   :  { %881 = vst [vmem:[%s1393_s3 + $0x40] sm:$0xff] %v865_v53  ;;  %883 = vst [vmem:[%s1393_s3 + $0x50] sm:$0xff] %v867_v54  ;;  %v829_v62 = vmax.f32 %v813_v55, 0.0  ;;  %v831_v61 = vmax.f32 %v815_v56, 0.0  ;;  %v728_v63 = vadd.f32 %v727_v50, %v1332_v6  ;;  %v805_v0 = vadd.f32 %v804_v52, %v1332_v6  ;;  %v729_v1 = vpop.f32.mrb[7].mxu0  ;;  %v806_v2 = vpop.f32.mrb[7].mxu1 }
 0x1c8   :  { %882 = vst [vmem:[%s1393_s3 + $0x48] sm:$0xff] %v866_v57  ;;  %884 = vst [vmem:[%s1393_s3 + $0x58] sm:$0xff] %v868_v58  ;;  %v830_v3 = vmax.f32 %v814_v59, 0.0  ;;  %v832_v4 = vmax.f32 %v816_v60, 0.0  ;;  %v730_v5 = vadd.f32 %v729_v1, %v1332_v6  ;;  %v807_v7 = vadd.f32 %v806_v2, %v1332_v6 }
 0x1c9   :  { %v845_v8 = vmin.f32 %v829_v62, 6.0  ;;  %v847_v9 = vmin.f32 %v831_v61, 6.0  ;;  %v821_v10 = vadd.f32 3.0, %v728_v63  ;;  %v823_v51 = vadd.f32 3.0, %v805_v0 }
 0x1ca   :  { %v846_v11 = vmin.f32 %v830_v3, 6.0  ;;  %v848_v12 = vmin.f32 %v832_v4, 6.0  ;;  %v822_v13 = vadd.f32 3.0, %v730_v5  ;;  %v824_v14 = vadd.f32 3.0, %v807_v7 }
 0x1cb   :  { %v861_v15 = vmul.f32 0.16666667, %v845_v8  ;;  %v863_v16 = vmul.f32 0.16666667, %v847_v9  ;;  %v837_v17 = vmax.f32 %v821_v10, 0.0  ;;  %v839_v18 = vmax.f32 %v823_v51, 0.0 }
 0x1cc   :  { %v862_v19 = vmul.f32 0.16666667, %v846_v11  ;;  %v864_v20 = vmul.f32 0.16666667, %v848_v12  ;;  %v838_v21 = vmax.f32 %v822_v13, 0.0  ;;  %v840_v22 = vmax.f32 %v824_v14, 0.0 }
 0x1cd   :  { %877 = vst [vmem:[%s1393_s3 + $0x20] sm:$0xff] %v861_v15  ;;  %879 = vst [vmem:[%s1393_s3 + $0x30] sm:$0xff] %v863_v16  ;;  %v853_v6 = vmin.f32 %v837_v17, 6.0  ;;  %v855_v23 = vmin.f32 %v839_v18, 6.0 }
 0x1ce   :  { %878 = vst [vmem:[%s1393_s3 + $0x28] sm:$0xff] %v862_v19  ;;  %880 = vst [vmem:[%s1393_s3 + $0x38] sm:$0xff] %v864_v20  ;;  %v854_v24 = vmin.f32 %v838_v21, 6.0  ;;  %v856_v25 = vmin.f32 %v840_v22, 6.0 }
 0x1cf   :  { %v869_v26 = vmul.f32 0.16666667, %v853_v6  ;;  %v871_v27 = vmul.f32 0.16666667, %v855_v23 }
 0x1d0   :  { %v870_v28 = vmul.f32 0.16666667, %v854_v24  ;;  %v872_v29 = vmul.f32 0.16666667, %v856_v25 }
 0x1d1   :  { %885 = vst [vmem:[%s1393_s3 + $0x60] sm:$0xff] %v869_v26  ;;  %887 = vst [vmem:[%s1393_s3 + $0x70] sm:$0xff] %v871_v27 }
 0x1d2   :  { %886 = vst [vmem:[%s1393_s3 + $0x68] sm:$0xff] %v870_v28  ;;  %888 = vst [vmem:[%s1393_s3 + $0x78] sm:$0xff] %v872_v29 }

</bundles_post_ra>
